<compile_context>
chip_gen: v6e
topology: v6e:2x2x1
jax: 0.10.0
libtpu: 0.0.40
codegen_flags: <defaults>
</compile_context>

<pallas_src>
import jax
import jax.numpy as jnp
import numpy as np
from jax.experimental import pallas as pl
from jax.experimental.pallas import tpu as pltpu

NEG_SLOPE = 0.01   # nn.LeakyReLU default
BN_EPS = 1e-5      # nn.BatchNorm1d default
LANE = 128
SUBLANE = 8


def _round_up(x, m):
    return ((x + m - 1) // m) * m


def _make_kernel(n_layers, bias_offsets, bias_widths):
    """Fused-MLP kernel body for a fixed layer count.

    Ref order: x, W_0 ... W_{n_layers-1}, biases(concat), out.
    Every layer (including the output layer, which has LeakyReLU as its
    output_activation) is: h = LeakyReLU(h @ W_l + b_l).
    """
    def kernel(*refs):
        x_ref = refs[0]
        w_refs = refs[1:1 + n_layers]
        b_ref = refs[1 + n_layers]
        o_ref = refs[2 + n_layers]

        h = x_ref[...]                                   # (tile_b, d0_pad) f32
        for li in range(n_layers):
            h = jnp.dot(h, w_refs[li][...],
                        preferred_element_type=jnp.float32)      # MXU
            off, width = bias_offsets[li], bias_widths[li]
            h = h + b_ref[:, off:off + width]                    # static slice
            h = jnp.maximum(h, NEG_SLOPE * h)                    # LeakyReLU
        o_ref[...] = h.astype(o_ref.dtype)
    return kernel


def network_block_forward(x, params):
    """params: dict with
         'hidden' = list of (W_t (in,out), b, gamma, beta, mean, var)  (1-D vecs)
         'out'    = (W_t (in,out), b)
       Returns the eval-mode forward of NetworkBlock (LeakyReLU output act)."""
    batch, in_dim = x.shape
    W_out, b_out = params["out"]
    out_dim = W_out.shape[1]

    # ---- Fold eval-mode BatchNorm into the Linear weights/bias (in f32) ----
    folded = []
    for (Wt, b, gamma, beta, mean, var) in params["hidden"]:
        scale = (gamma * jax.lax.rsqrt(var + BN_EPS)).astype(jnp.float32)
        Wf = Wt.astype(jnp.float32) * scale[None, :]
        bf = (b.astype(jnp.float32) - mean) * scale + beta
        folded.append((Wf, bf))
    folded.append((W_out.astype(jnp.float32), b_out.astype(jnp.float32)))
    n_layers = len(folded)

    # ---- Lane-pad all feature dims to 128; pad batch to the tile size ----
    dims = [in_dim] + [w.shape[1] for (w, _) in folded]
    dims_pad = [_round_up(d, LANE) for d in dims]

    tile_b = 512 if batch >= 512 else _round_up(batch, SUBLANE)
    batch_pad = _round_up(batch, tile_b)

    x_pad = jnp.zeros((batch_pad, dims_pad[0]), jnp.float32)
    x_pad = x_pad.at[:batch, :in_dim].set(x.astype(jnp.float32))

    w_padded = []
    b_chunks = []
    for li, (Wf, bf) in enumerate(folded):
        din, dout = Wf.shape
        din_p, dout_p = dims_pad[li], dims_pad[li + 1]
        Wp = jnp.zeros((din_p, dout_p), jnp.float32).at[:din, :dout].set(Wf)
        bp = jnp.zeros((1, dout_p), jnp.float32).at[0, :dout].set(bf)
        w_padded.append(Wp)
        b_chunks.append(bp)
    biases = jnp.concatenate(b_chunks, axis=1)           # single (1, sum) input

    bias_widths = tuple(dims_pad[1:])
    offs = np.cumsum([0] + list(bias_widths))
    bias_offsets = tuple(int(o) for o in offs[:n_layers])

    # ---- Grid / specs: grid only over batch, weights resident ----
    grid = (batch_pad // tile_b,)
    in_specs = [pl.BlockSpec((tile_b, dims_pad[0]), lambda i: (i, 0))]
    for Wp in w_padded:
        in_specs.append(pl.BlockSpec(Wp.shape, lambda i: (0, 0)))
    in_specs.append(pl.BlockSpec(biases.shape, lambda i: (0, 0)))
    out_spec = pl.BlockSpec((tile_b, dims_pad[-1]), lambda i: (i, 0))

    flops = 2 * batch_pad * sum(dims_pad[i] * dims_pad[i + 1]
                                for i in range(n_layers))
    bytes_accessed = 4 * (x_pad.size + sum(w.size for w in w_padded)
                          + biases.size + batch_pad * dims_pad[-1])
    cost = pl.CostEstimate(flops=flops, transcendentals=0,
                           bytes_accessed=bytes_accessed)

    kernel = _make_kernel(n_layers, bias_offsets, bias_widths)
    out_pad = pl.pallas_call(
        kernel,
        out_shape=jax.ShapeDtypeStruct((batch_pad, dims_pad[-1]), jnp.float32),
        grid_spec=pltpu.PrefetchScalarGridSpec(
            num_scalar_prefetch=0,
            grid=grid,
            in_specs=in_specs,
            out_specs=out_spec,
        ),
        compiler_params=pltpu.CompilerParams(
            dimension_semantics=("parallel",)),
        cost_estimate=cost,
    )(x_pad, *w_padded, biases)

    return out_pad[:batch, :out_dim]


def init_params(key, input_dim, hidden_dims, output_dim):
    """Deterministic parameter init mirroring the module's shapes.
    Linear weights: Xavier-uniform; biases: U(-1/sqrt(fan_in), 1/sqrt(fan_in)).
    BN params get non-trivial deterministic values to exercise the folded
    affine-normalize path."""
    dims = [input_dim] + list(hidden_dims) + [output_dim]
    hidden = []
    for idx in range(len(hidden_dims)):
        fan_in, fan_out = dims[idx], dims[idx + 1]
        key, kw, kb, kg, kbt, km, kv = jax.random.split(key, 7)
        limit = float(np.sqrt(6.0 / (fan_in + fan_out)))      # xavier_uniform_
        W = jax.random.uniform(kw, (fan_out, fan_in), jnp.float32, -limit, limit)
        b_lim = 1.0 / float(np.sqrt(fan_in))
        b = jax.random.uniform(kb, (fan_out,), jnp.float32, -b_lim, b_lim)
        gamma = 1.0 + 0.1 * jax.random.normal(kg, (fan_out,), jnp.float32)
        beta = 0.1 * jax.random.normal(kbt, (fan_out,), jnp.float32)
        mean = 0.1 * jax.random.normal(km, (fan_out,), jnp.float32)
        var = jax.random.uniform(kv, (fan_out,), jnp.float32, 0.5, 1.5)
        hidden.append((W.T, b, gamma, beta, mean, var))        # W.T: (in, out)
    fan_in, fan_out = dims[-2], dims[-1]
    key, kw, kb = jax.random.split(key, 3)
    limit = float(np.sqrt(6.0 / (fan_in + fan_out)))
    W = jax.random.uniform(kw, (fan_out, fan_in), jnp.float32, -limit, limit)
    b_lim = 1.0 / float(np.sqrt(fan_in))
    b = jax.random.uniform(kb, (fan_out,), jnp.float32, -b_lim, b_lim)
    out = (W.T, b)
    return {"hidden": hidden, "out": out}


def reference_forward(x, params):
    """Pure-JAX reference using the UNFOLDED params (matches PyTorch eval)."""
    h = x.astype(jnp.float32)
    for (Wt, b, g, bt, mu, var) in params["hidden"]:
        h = h @ Wt + b
        h = (h - mu) / jnp.sqrt(var + BN_EPS) * g + bt
        h = jnp.where(h > 0, h, NEG_SLOPE * h)
    Wt, b = params["out"]
    h = h @ Wt + b
    return jnp.where(h > 0, h, NEG_SLOPE * h)


if __name__ == "__main__":
    # Small shapes consistent with the module's dense-MLP forward.
    batch, input_dim, hidden_dims, output_dim = 8, 32, [64, 64], 16

    key = jax.random.PRNGKey(0)
    key, kx, kp = jax.random.split(key, 3)
    x = jax.random.normal(kx, (batch, input_dim), jnp.float32)
    params = init_params(kp, input_dim, hidden_dims, output_dim)

    # TODO(synk): training-mode dropout / input masking is stochastic and is
    # intentionally omitted (eval-mode forward is reproduced exactly).

    out = network_block_forward(x, params)
    out = jax.block_until_ready(out)

    ref = reference_forward(x, params)
    assert out.shape == (batch, output_dim)
    assert jnp.allclose(out, ref, atol=1e-4, rtol=1e-4), "mismatch vs reference"

    print("KERNEL_OK")
</pallas_src>

<mosaic_0001>
module attributes {stable_mosaic.version = 11 : i64} {
  func.func @kernel(%arg0: i32, %arg1: memref<8x128xf32, #tpu.memory_space<vmem>>, %arg2: memref<128x128xf32, #tpu.memory_space<vmem>>, %arg3: memref<128x128xf32, #tpu.memory_space<vmem>>, %arg4: memref<128x128xf32, #tpu.memory_space<vmem>>, %arg5: memref<1x384xf32, #tpu.memory_space<vmem>>, %arg6: memref<8x128xf32, #tpu.memory_space<vmem>>) attributes {dimension_semantics = [#tpu.dimension_semantics<parallel>], iteration_bounds = array<i64: 1>, scalar_prefetch = 0 : i64, scratch_operands = 0 : i64, tpu.core_type = #tpu.core_type<tc>, window_params = [{transform_indices = @transform_0, window_bounds = array<i64: 8, 128>}, {pipeline_mode = #tpu.pipeline_mode<synchronous>, transform_indices = @transform_1, window_bounds = array<i64: 128, 128>}, {pipeline_mode = #tpu.pipeline_mode<synchronous>, transform_indices = @transform_2, window_bounds = array<i64: 128, 128>}, {pipeline_mode = #tpu.pipeline_mode<synchronous>, transform_indices = @transform_3, window_bounds = array<i64: 128, 128>}, {pipeline_mode = #tpu.pipeline_mode<synchronous>, transform_indices = @transform_4, window_bounds = array<i64: 1, 384>}, {transform_indices = @transform_5, window_bounds = array<i64: 8, 128>}]} {
    %c0 = arith.constant 0 : index
    %c0_0 = arith.constant 0 : index
    %0 = vector.load %arg1[%c0, %c0_0] : memref<8x128xf32, #tpu.memory_space<vmem>>, vector<8x128xf32>
    %c0_1 = arith.constant 0 : index
    %c0_2 = arith.constant 0 : index
    %1 = vector.load %arg2[%c0_1, %c0_2] : memref<128x128xf32, #tpu.memory_space<vmem>>, vector<128x128xf32>
    %cst = arith.constant dense<0.000000e+00> : vector<8x128xf32>
    %2 = tpu.matmul %0, %1, %cst {dimension_numbers = #tpu.dot_dimension_numbers<[1], [0], [0], [1], [0, 0, 1, 1], [], []>} : vector<8x128xf32>, vector<128x128xf32>, vector<8x128xf32> -> vector<8x128xf32>
    %c0_3 = arith.constant 0 : index
    %c0_4 = arith.constant 0 : index
    %3 = vector.load %arg5[%c0_3, %c0_4] : memref<1x384xf32, #tpu.memory_space<vmem>>, vector<1x128xf32>
    %4 = vector.broadcast %3 : vector<1x128xf32> to vector<8x128xf32>
    %5 = arith.addf %2, %4 : vector<8x128xf32>
    %cst_5 = arith.constant 0.00999999977 : f32
    %6 = vector.broadcast %cst_5 : f32 to vector<8x128xf32>
    %7 = arith.mulf %6, %5 : vector<8x128xf32>
    %8 = arith.maximumf %5, %7 : vector<8x128xf32>
    %c0_6 = arith.constant 0 : index
    %c0_7 = arith.constant 0 : index
    %9 = vector.load %arg3[%c0_6, %c0_7] : memref<128x128xf32, #tpu.memory_space<vmem>>, vector<128x128xf32>
    %cst_8 = arith.constant dense<0.000000e+00> : vector<8x128xf32>
    %10 = tpu.matmul %8, %9, %cst_8 {dimension_numbers = #tpu.dot_dimension_numbers<[1], [0], [0], [1], [0, 0, 1, 1], [], []>} : vector<8x128xf32>, vector<128x128xf32>, vector<8x128xf32> -> vector<8x128xf32>
    %c0_9 = arith.constant 0 : index
    %c128 = arith.constant 128 : index
    %11 = vector.load %arg5[%c0_9, %c128] : memref<1x384xf32, #tpu.memory_space<vmem>>, vector<1x128xf32>
    %12 = vector.broadcast %11 : vector<1x128xf32> to vector<8x128xf32>
    %13 = arith.addf %10, %12 : vector<8x128xf32>
    %cst_10 = arith.constant 0.00999999977 : f32
    %14 = vector.broadcast %cst_10 : f32 to vector<8x128xf32>
    %15 = arith.mulf %14, %13 : vector<8x128xf32>
    %16 = arith.maximumf %13, %15 : vector<8x128xf32>
    %c0_11 = arith.constant 0 : index
    %c0_12 = arith.constant 0 : index
    %17 = vector.load %arg4[%c0_11, %c0_12] : memref<128x128xf32, #tpu.memory_space<vmem>>, vector<128x128xf32>
    %cst_13 = arith.constant dense<0.000000e+00> : vector<8x128xf32>
    %18 = tpu.matmul %16, %17, %cst_13 {dimension_numbers = #tpu.dot_dimension_numbers<[1], [0], [0], [1], [0, 0, 1, 1], [], []>} : vector<8x128xf32>, vector<128x128xf32>, vector<8x128xf32> -> vector<8x128xf32>
    %c0_14 = arith.constant 0 : index
    %c256 = arith.constant 256 : index
    %19 = vector.load %arg5[%c0_14, %c256] : memref<1x384xf32, #tpu.memory_space<vmem>>, vector<1x128xf32>
    %20 = vector.broadcast %19 : vector<1x128xf32> to vector<8x128xf32>
    %21 = arith.addf %18, %20 : vector<8x128xf32>
    %cst_15 = arith.constant 0.00999999977 : f32
    %22 = vector.broadcast %cst_15 : f32 to vector<8x128xf32>
    %23 = arith.mulf %22, %21 : vector<8x128xf32>
    %24 = arith.maximumf %21, %23 : vector<8x128xf32>
    %c0_16 = arith.constant 0 : index
    %c0_17 = arith.constant 0 : index
    %25 = vector.load %arg6[%c0_16, %c0_17] : memref<8x128xf32, #tpu.memory_space<vmem>>, vector<8x128xf32>
    tpu.vector_store %arg6[%c0_16, %c0_17], %24 {strides = array<i32>} : memref<8x128xf32, #tpu.memory_space<vmem>>, vector<8x128xf32>,
    return
  }
  func.func @transform_0(%arg0: i32) -> (i32, i32) {
    %c0_i32 = arith.constant 0 : i32
    %c0_i32_0 = arith.constant 0 : i32
    return %arg0, %c0_i32 : i32, i32
  }
  func.func @transform_1(%arg0: i32) -> (i32, i32) {
    %c0_i32 = arith.constant 0 : i32
    %c0_i32_0 = arith.constant 0 : i32
    %c0_i32_1 = arith.constant 0 : i32
    return %c0_i32, %c0_i32_0 : i32, i32
  }
  func.func @transform_2(%arg0: i32) -> (i32, i32) {
    %c0_i32 = arith.constant 0 : i32
    %c0_i32_0 = arith.constant 0 : i32
    %c0_i32_1 = arith.constant 0 : i32
    return %c0_i32, %c0_i32_0 : i32, i32
  }
  func.func @transform_3(%arg0: i32) -> (i32, i32) {
    %c0_i32 = arith.constant 0 : i32
    %c0_i32_0 = arith.constant 0 : i32
    %c0_i32_1 = arith.constant 0 : i32
    return %c0_i32, %c0_i32_0 : i32, i32
  }
  func.func @transform_4(%arg0: i32) -> (i32, i32) {
    %c0_i32 = arith.constant 0 : i32
    %c0_i32_0 = arith.constant 0 : i32
    %c0_i32_1 = arith.constant 0 : i32
    return %c0_i32, %c0_i32_0 : i32, i32
  }
  func.func @transform_5(%arg0: i32) -> (i32, i32) {
    %c0_i32 = arith.constant 0 : i32
    %c0_i32_0 = arith.constant 0 : i32
    return %arg0, %c0_i32 : i32, i32
  }
}

</mosaic_0001>

<bundles_post_ra>
// kernel: tpu_custom_call.1
= control target key start
LH: loop header
LB: loop body
LE: loop exit
PB: predicated region body
PF: predicated region fallthrough
CT: control target
= control target key end

     0   :  { %10 = vsyncpa [#allocation3], 0  ;;  %s780_s0 = inlined_call_operand.hbm [shape: f32[8,128], index: 0, kind: input, shape index: {}]   ;;  %s781_s1 = inlined_call_operand.hbm [shape: f32[128,128], index: 1, kind: input, shape index: {}]   ;;  %s782_s2 = inlined_call_operand.hbm [shape: f32[128,128], index: 2, kind: input, shape index: {}]   ;;  %s783_s3 = inlined_call_operand.hbm [shape: f32[128,128], index: 3, kind: input, shape index: {}]   ;;  %s784_s4 = inlined_call_operand.vmem [shape: f32[1,384], index: 4, kind: input, shape index: {}]   ;;  %s785_s5 = inlined_call_operand.hbm [shape: f32[8,128], index: 5, kind: output, shape index: {}]  }
   0x1   :  { %11 = vsyncpa [#allocation6], 0 }
   0x2   :  { %12 = vsyncpa [#allocation9], 0 }
   0x3   :  { %13 = vsyncpa [#allocation4], 0  ;;  %s654_s18 = smov [#allocation5]  }
   0x4   :  { %s29_s19 = sshll.u32 %s654_s18, 4  ;;  %s30_s19 = int_to_ptr.vmem [resolvable:$true] %s29_s19 }
   0x5   :  { %s554_s20 = scalar_lea.vmem %s30_s19, 2048  ;;  %p559_p1 = scmp.lt.s32.totalorder %s30_s19, %s30_s19 }
   0x6   :  { %p555_p0 = scmp.ne.s32.totalorder %s30_s19, %s554_s20  ;;  %p560_p2 = scmp.lt.s32.totalorder %s554_s20, %s554_s20 }
   0x8   :  { %p561_p3 = por %p560_p2, %p559_p1 }
   0xa   :  { %p562_p4 = pnand %p561_p3, %p555_p0 }
   0xc   :  { %565 = shalt.err (!%p562_p4)
}
   0xd   :  { %s655_s21 = smov 128   ;;  %s656_s22 = smov 8  }
   0xe   :  { %35 = dma.hbm_to_vmem [thread:$0]  %s781_s1, 2048, %s30_s19, [#allocation6], %s655_s21, %s655_s21, %s656_s22  }
   0xf   :  { %s657_s25 = smov [#allocation2]   ;;  %s658_s27 = smov [#allocation7]  }
  0x10   :  { %s20_s26 = sshll.u32 %s657_s25, 4  ;;  %s41_s28 = sshll.u32 %s658_s27, 4  ;;  %s21_s26 = int_to_ptr.vmem [resolvable:$true] %s20_s26  ;;  %s42_s28 = int_to_ptr.vmem [resolvable:$true] %s41_s28 }
  0x11   :  { %s574_s29 = scalar_lea.vmem %s21_s26, 128  ;;  %p579_p6 = scmp.lt.s32.totalorder %s21_s26, %s21_s26 }
  0x12   :  { %p575_p5 = scmp.ne.s32.totalorder %s21_s26, %s574_s29  ;;  %p580_p7 = scmp.lt.s32.totalorder %s574_s29, %s574_s29 }
  0x14   :  { %p581_p8 = por %p580_p7, %p579_p6 }
  0x16   :  { %p582_p9 = pnand %p581_p8, %p575_p5 }
  0x18   :  { %585 = shalt.err (!%p582_p9)
}
  0x19   :  { %23 = dma.hbm_to_vmem [thread:$0]  %s780_s0, 128, %s21_s26, [#allocation3]  }
  0x1a   :  { %s594_s7 = scalar_lea.vmem %s42_s28, 2048  ;;  %p599_p11 = scmp.lt.s32.totalorder %s42_s28, %s42_s28 }
  0x1b   :  { %p595_p10 = scmp.ne.s32.totalorder %s42_s28, %s594_s7  ;;  %p600_p12 = scmp.lt.s32.totalorder %s594_s7, %s594_s7 }
  0x1d   :  { %p601_p13 = por %p600_p12, %p599_p11 }
  0x1f   :  { %p602_p0 = pnand %p601_p13, %p595_p10 }
  0x21   :  { %605 = shalt.err (!%p602_p0)
}
  0x22   :  { %47 = dma.hbm_to_vmem [thread:$0]  %s782_s2, 2048, %s42_s28, [#allocation6], %s655_s21, %s655_s21, %s656_s22  }
  0x23   :  { %s659_s9 = smov [#allocation8]  }
  0x24   :  { %s53_s10 = sshll.u32 %s659_s9, 4  ;;  %s54_s10 = int_to_ptr.vmem [resolvable:$true] %s53_s10 }
  0x25   :  { %s614_s11 = scalar_lea.vmem %s54_s10, 2048  ;;  %p619_p2 = scmp.lt.s32.totalorder %s54_s10, %s54_s10 }
  0x26   :  { %p615_p1 = scmp.ne.s32.totalorder %s54_s10, %s614_s11  ;;  %p620_p3 = scmp.lt.s32.totalorder %s614_s11, %s614_s11 }
  0x28   :  { %p621_p4 = por %p620_p3, %p619_p2 }
  0x2a   :  { %p622_p5 = pnand %p621_p4, %p615_p1 }
  0x2c   :  { %625 = shalt.err (!%p622_p5)
}
  0x2d   :  { %59 = dma.hbm_to_vmem [thread:$0]  %s783_s3, 2048, %s54_s10, [#allocation9], %s655_s21, %s655_s21, %s656_s22  }
  0x2e   :  { %646 = dma.done.wait [#allocation3], 128  }
  0x2f   :  { %647 = vsyncadd [#allocation3], 4294967168 }
  0x30   :  { %648 = dma.done.wait [#allocation6], 4096  }
  0x31   :  { %649 = vsyncadd [#allocation6], 4294963200 }
  0x32   :  { %650 = dma.done.wait [#allocation9], 2048  }
  0x33   :  { %651 = vsyncadd [#allocation9], 4294965248  ;;  %v660_v0 = vmov 0.0   ;;  %vm661_vm0 = vmmov 0   ;;  %v90_v1 = vld [vmem:[#allocation5 + $0x78] sm:$0xff]  ;;  %v89_v2 = vld [vmem:[#allocation5 + $0x70] sm:$0xff] }
  0x34   :  { %432 = vmatprep.subr.mxu0 %v660_v0  ;;  %464 = vmatprep.mubr.msk.f32.mxu0 %vm661_vm0, %v660_v0  ;;  %v88_v3 = vld [vmem:[#allocation5 + $0x68] sm:$0xff]  ;;  %v87_v4 = vld [vmem:[#allocation5 + $0x60] sm:$0xff]  ;;  %v185_v5 = vld [vmem:[#allocation7 + $0x78] sm:$0xff]  ;;  %s662_s17 = smov [#allocation10]  }
  0x35   :  { %467 = vmatprep.subr.mxu1 %v660_v0  ;;  %499 = vmatprep.mubr.msk.f32.mxu1 %vm661_vm0, %v660_v0  ;;  %v86_v6 = vld [vmem:[#allocation5 + $0x58] sm:$0xff]  ;;  %v184_v7 = vld [vmem:[#allocation7 + $0x70] sm:$0xff]  ;;  %v183_v8 = vld [vmem:[#allocation7 + $0x68] sm:$0xff]  ;;  %s367_s18 = sshll.u32 %s662_s17, 4  ;;  %s368_s18 = int_to_ptr.vmem [resolvable:$true] %s367_s18 }
  0x36   :  { %433 = vmatpush3.msra.mxu0 %v90_v1  ;;  %468 = vmatpush3.msra.mxu1 %v185_v5  ;;  %v85_v9 = vld [vmem:[#allocation5 + $0x50] sm:$0xff]  ;;  %v182_v10 = vld [vmem:[#allocation7 + $0x60] sm:$0xff]  ;;  %v84_v11 = vld [vmem:[#allocation5 + $0x48] sm:$0xff]  ;;  %s626_s19 = scalar_lea.vmem %s368_s18, 128  ;;  %p631_p7 = scmp.lt.s32.totalorder %s368_s18, %s368_s18 }
  0x37   :  { %434 = vmatprep.subr.mxu0 %v660_v0  ;;  %469 = vmatprep.subr.mxu1 %v660_v0  ;;  %v181_v12 = vld [vmem:[#allocation7 + $0x58] sm:$0xff]  ;;  %v83_v13 = vld [vmem:[#allocation5 + $0x40] sm:$0xff]  ;;  %v180_v14 = vld [vmem:[#allocation7 + $0x50] sm:$0xff]  ;;  %p627_p6 = scmp.ne.s32.totalorder %s368_s18, %s626_s19  ;;  %p632_p8 = scmp.lt.s32.totalorder %s626_s19, %s626_s19 }
  0x38   :  { %435 = vmatpush3.msra.mxu0 %v89_v2  ;;  %470 = vmatpush3.msra.mxu1 %v184_v7  ;;  %v82_v15 = vld [vmem:[#allocation5 + $0x38] sm:$0xff]  ;;  %v179_v16 = vld [vmem:[#allocation7 + $0x48] sm:$0xff]  ;;  %v81_v17 = vld [vmem:[#allocation5 + $0x30] sm:$0xff] }
  0x39   :  { %436 = vmatprep.subr.mxu0 %v660_v0  ;;  %471 = vmatprep.subr.mxu1 %v660_v0  ;;  %v178_v18 = vld [vmem:[#allocation7 + $0x40] sm:$0xff]  ;;  %v80_v19 = vld [vmem:[#allocation5 + $0x28] sm:$0xff]  ;;  %v177_v20 = vld [vmem:[#allocation7 + $0x38] sm:$0xff]  ;;  %p633_p9 = por %p632_p8, %p631_p7 }
  0x3a   :  { %437 = vmatpush3.msra.mxu0 %v88_v3  ;;  %472 = vmatpush3.msra.mxu1 %v183_v8  ;;  %v79_v21 = vld [vmem:[#allocation5 + $0x20] sm:$0xff]  ;;  %v176_v22 = vld [vmem:[#allocation7 + $0x30] sm:$0xff]  ;;  %v78_v23 = vld [vmem:[#allocation5 + $0x18] sm:$0xff] }
  0x3b   :  { %438 = vmatprep.subr.mxu0 %v660_v0  ;;  %473 = vmatprep.subr.mxu1 %v660_v0  ;;  %v175_v24 = vld [vmem:[#allocation7 + $0x28] sm:$0xff]  ;;  %v77_v25 = vld [vmem:[#allocation5 + $0x10] sm:$0xff]  ;;  %v174_v26 = vld [vmem:[#allocation7 + $0x20] sm:$0xff]  ;;  %p634_p10 = pnand %p633_p9, %p627_p6 }
  0x3c   :  { %439 = vmatpush3.msra.mxu0 %v87_v4  ;;  %474 = vmatpush3.msra.mxu1 %v182_v10  ;;  %v76_v27 = vld [vmem:[#allocation5 + $0x8] sm:$0xff]  ;;  %v75_v28 = vld [vmem:[#allocation5] sm:$0xff]  ;;  %v74_v29 = vld [vmem:[#allocation2] sm:$0xff] }
  0x3d   :  { %440 = vmatprep.subr.mxu0 %v660_v0  ;;  %475 = vmatprep.subr.mxu1 %v660_v0  ;;  %v173_v30 = vld [vmem:[#allocation7 + $0x18] sm:$0xff]  ;;  %v172_v31 = vld [vmem:[#allocation7 + $0x10] sm:$0xff]  ;;  %v171_v32 = vld [vmem:[#allocation7 + $0x8] sm:$0xff] }
  0x3e   :  { %441 = vmatpush3.msra.mxu0 %v86_v6  ;;  %476 = vmatpush3.msra.mxu1 %v181_v12  ;;  %v170_v33 = vld [vmem:[#allocation7] sm:$0xff]  ;;  %v280_v34 = vld [vmem:[#allocation8 + $0x78] sm:$0xff]  ;;  %v279_v35 = vld [vmem:[#allocation8 + $0x70] sm:$0xff] }
  0x3f   :  { %442 = vmatprep.subr.mxu0 %v660_v0  ;;  %477 = vmatprep.subr.mxu1 %v660_v0  ;;  %v278_v36 = vld [vmem:[#allocation8 + $0x68] sm:$0xff]  ;;  %v277_v37 = vld [vmem:[#allocation8 + $0x60] sm:$0xff]  ;;  %v276_v38 = vld [vmem:[#allocation8 + $0x58] sm:$0xff] }
  0x40   :  { %443 = vmatpush3.msra.mxu0 %v85_v9  ;;  %478 = vmatpush3.msra.mxu1 %v180_v14  ;;  %v275_v39 = vld [vmem:[#allocation8 + $0x50] sm:$0xff]  ;;  %v274_v40 = vld [vmem:[#allocation8 + $0x48] sm:$0xff]  ;;  %v273_v41 = vld [vmem:[#allocation8 + $0x40] sm:$0xff] }
  0x41   :  { %444 = vmatprep.subr.mxu0 %v660_v0  ;;  %479 = vmatprep.subr.mxu1 %v660_v0  ;;  %v272_v42 = vld [vmem:[#allocation8 + $0x38] sm:$0xff]  ;;  %v271_v43 = vld [vmem:[#allocation8 + $0x30] sm:$0xff]  ;;  %v270_v44 = vld [vmem:[#allocation8 + $0x28] sm:$0xff] }
  0x42   :  { %445 = vmatpush3.msra.mxu0 %v84_v11  ;;  %480 = vmatpush3.msra.mxu1 %v179_v16  ;;  %v269_v45 = vld [vmem:[#allocation8 + $0x20] sm:$0xff]  ;;  %v378_v46 = vld [vmem:[%s784_s4] ss:$0 sm:$0xff]  ;;  %v267_v53 = vld [vmem:[#allocation8 + $0x10] sm:$0xff] }
  0x43   :  { %446 = vmatprep.subr.mxu0 %v660_v0  ;;  %481 = vmatprep.subr.mxu1 %v660_v0  ;;  %v268_v52 = vld [vmem:[#allocation8 + $0x18] sm:$0xff]  ;;  %v266_v54 = vld [vmem:[#allocation8 + $0x8] sm:$0xff]  ;;  %v265_v55 = vld [vmem:[#allocation8] sm:$0xff] }
  0x44   :  { %447 = vmatpush3.msra.mxu0 %v83_v13  ;;  %482 = vmatpush3.msra.mxu1 %v178_v18  ;;  %v379_v56 = vld [vmem:[%s784_s4 + $0x1] ss:$0 sm:$0xff]  ;;  %v380_v62 = vld [vmem:[%s784_s4 + $0x2] ss:$0 sm:$0xff] }
  0x45   :  { %448 = vmatprep.subr.mxu0 %v660_v0  ;;  %483 = vmatprep.subr.mxu1 %v660_v0 }
  0x46   :  { %449 = vmatpush3.msra.mxu0 %v82_v15  ;;  %484 = vmatpush3.msra.mxu1 %v177_v20 }
  0x47   :  { %450 = vmatprep.subr.mxu0 %v660_v0  ;;  %485 = vmatprep.subr.mxu1 %v660_v0 }
  0x48   :  { %451 = vmatpush3.msra.mxu0 %v81_v17  ;;  %486 = vmatpush3.msra.mxu1 %v176_v22 }
  0x49   :  { %452 = vmatprep.subr.mxu0 %v660_v0  ;;  %487 = vmatprep.subr.mxu1 %v660_v0 }
  0x4a   :  { %453 = vmatpush3.msra.mxu0 %v80_v19  ;;  %488 = vmatpush3.msra.mxu1 %v175_v24 }
  0x4b   :  { %454 = vmatprep.subr.mxu0 %v660_v0  ;;  %489 = vmatprep.subr.mxu1 %v660_v0 }
  0x4c   :  { %455 = vmatpush3.msra.mxu0 %v79_v21  ;;  %490 = vmatpush3.msra.mxu1 %v174_v26 }
  0x4d   :  { %456 = vmatprep.subr.mxu0 %v660_v0  ;;  %491 = vmatprep.subr.mxu1 %v660_v0 }
  0x4e   :  { %457 = vmatpush3.msra.mxu0 %v78_v23  ;;  %492 = vmatpush3.msra.mxu1 %v173_v30 }
  0x4f   :  { %458 = vmatprep.subr.mxu0 %v660_v0  ;;  %493 = vmatprep.subr.mxu1 %v660_v0 }
  0x50   :  { %459 = vmatpush3.msra.mxu0 %v77_v25  ;;  %494 = vmatpush3.msra.mxu1 %v172_v31 }
  0x51   :  { %460 = vmatprep.subr.mxu0 %v660_v0  ;;  %495 = vmatprep.subr.mxu1 %v660_v0 }
  0x52   :  { %461 = vmatpush3.msra.mxu0 %v76_v27  ;;  %496 = vmatpush3.msra.mxu1 %v171_v32 }
  0x53   :  { %462 = vmatprep.subr.mxu0 %v660_v0  ;;  %497 = vmatprep.subr.mxu1 %v660_v0 }
  0x54   :  { %463 = vmatpush3.msra.mxu0 %v75_v28  ;;  %498 = vmatpush3.msra.mxu1 %v170_v33 }
  0x55   :  { %465 = vmatmul.mubr.f32.vlgmr.msra.gmra.mxu0 %v74_v29  ;;  %502 = vmatprep.subr.mxu0 %v660_v0 }
  0x56   :  { %534 = vmatprep.mubr.msk.f32.mxu0 %vm661_vm0, %v660_v0  ;;  %503 = vmatpush3.msra.mxu0 %v280_v34 }
  0x57   :  { %504 = vmatprep.subr.mxu0 %v660_v0 }
  0x58   :  { %505 = vmatpush3.msra.mxu0 %v279_v35 }
  0x59   :  { %506 = vmatprep.subr.mxu0 %v660_v0 }
  0x5a   :  { %507 = vmatpush3.msra.mxu0 %v278_v36 }
  0x5b   :  { %508 = vmatprep.subr.mxu0 %v660_v0 }
  0x5c   :  { %509 = vmatpush3.msra.mxu0 %v277_v37 }
  0x5d   :  { %510 = vmatprep.subr.mxu0 %v660_v0 }
  0x5e   :  { %511 = vmatpush3.msra.mxu0 %v276_v38 }
  0x5f   :  { %512 = vmatprep.subr.mxu0 %v660_v0 }
  0x60   :  { %513 = vmatpush3.msra.mxu0 %v275_v39 }
  0x61   :  { %514 = vmatprep.subr.mxu0 %v660_v0 }
  0x62   :  { %515 = vmatpush3.msra.mxu0 %v274_v40 }
  0x63   :  { %516 = vmatprep.subr.mxu0 %v660_v0 }
  0x64   :  { %517 = vmatpush3.msra.mxu0 %v273_v41 }
  0x65   :  { %518 = vmatprep.subr.mxu0 %v660_v0 }
  0x66   :  { %519 = vmatpush3.msra.mxu0 %v272_v42 }
  0x67   :  { %520 = vmatprep.subr.mxu0 %v660_v0 }
  0x68   :  { %521 = vmatpush3.msra.mxu0 %v271_v43 }
  0x69   :  { %522 = vmatprep.subr.mxu0 %v660_v0 }
  0x6a   :  { %523 = vmatpush3.msra.mxu0 %v270_v44 }
  0x6b   :  { %524 = vmatprep.subr.mxu0 %v660_v0 }
  0x6c   :  { %525 = vmatpush3.msra.mxu0 %v269_v45 }
  0x6d   :  { %526 = vmatprep.subr.mxu0 %v660_v0 }
  0x6e   :  { %527 = vmatpush3.msra.mxu0 %v268_v52 }
  0x6f   :  { %528 = vmatprep.subr.mxu0 %v660_v0 }
  0x70   :  { %529 = vmatpush3.msra.mxu0 %v267_v53 }
  0x71   :  { %530 = vmatprep.subr.mxu0 %v660_v0 }
  0x72   :  { %531 = vmatpush3.msra.mxu0 %v266_v54 }
  0x73   :  { %532 = vmatprep.subr.mxu0 %v660_v0 }
  0x74   :  { %533 = vmatpush3.msra.mxu0 %v265_v55 }
 0x115   :  { %v164_v47 = vpop.f32.mrf.mxu0 }
 0x116   :  { %v165_v48 = vadd.f32 %v378_v46, %v164_v47 }
 0x117   :  { %v466_v49 = vpop.f32.mrf.mxu0 }
 0x118   :  { %v168_v50 = vmul.f32 0.01, %v165_v48 }
 0x11a   :  { %v169_v51 = vmax.f32 %v165_v48, %v168_v50 }
 0x11c   :  { %500 = vmatmul.mubr.f32.vlgmr.msra.gmra.mxu1 %v169_v51 }
 0x1dc   :  { %v259_v57 = vpop.f32.mrf.mxu1 }
 0x1dd   :  { %v260_v58 = vadd.f32 %v379_v56, %v259_v57 }
 0x1de   :  { %v501_v59 = vpop.f32.mrf.mxu1 }
 0x1df   :  { %v263_v60 = vmul.f32 0.01, %v260_v58 }
 0x1e1   :  { %v264_v61 = vmax.f32 %v260_v58, %v263_v60 }
 0x1e3   :  { %535 = vmatmul.mubr.f32.vlgmr.msra.gmra.mxu0 %v264_v61 }
 0x2a3   :  { %v354_v63 = vpop.f32.mrf.mxu0 }
 0x2a4   :  { %v355_v1 = vadd.f32 %v380_v62, %v354_v63 }
 0x2a5   :  { %v536_v2 = vpop.f32.mrf.mxu0 }
 0x2a6   :  { %v358_v0 = vmul.f32 0.01, %v355_v1 }
 0x2a8   :  { %v359_v3 = vmax.f32 %v355_v1, %v358_v0 }
 0x2aa   :  { %360 = vst [vmem:[#allocation10] sm:$0xff] %v359_v3 }
 0x2ab   :  { %637 = shalt.err (!%p634_p10)
}
 0x2ac   :  { %370 = dma.vmem_to_hbm [thread:$0]  %s368_s18, 128, %s785_s5, [#allocation4]  }
 0x2ad   :  { %652 = dma.done.wait [#allocation4], 128  }
 0x2ae   :  { %653 = vsyncadd [#allocation4], 4294967168 }
 0x2af   :  { %374 = vsyncpa [#allocation3], 1 }
 0x2b0   :  { %375 = vsyncpa [#allocation6], 1 }
 0x2b1   :  { %376 = vsyncpa [#allocation9], 1 }
 0x2b2   :  { %377 = vsyncpa [#allocation4], 1 }

</bundles_post_ra>
